<compile_context>
chip_gen: v5e
topology: v5e:2x2
jax: 0.10.0
libtpu: 0.0.40
codegen_flags: <defaults>
</compile_context>

<pallas_src>
import numpy as np

import jax
import jax.numpy as jnp
from jax.experimental import pallas as pl
from jax.experimental.pallas import tpu as pltpu

_LANE = 128
_MAX_TILE_ROWS = 8192          # absolute cap on the leading tile dim
_EW_TOTAL_BUDGET = 8 << 20     # summed per-block VMEM budget over all inputs (elementwise path)
_ROW_BUDGET = 2 << 20          # per-input per-block VMEM budget for row-tiled kernels
_VMEM_MARGIN = 8 << 20         # slack for compiler temporaries
_VMEM_LIMIT_FLOOR = 32 << 20   # never request less than the v6e/v7x default scoped limit
_VMEM_LIMIT_CEIL = 40 << 20    # stay well under v7x's 64 MiB physical VMEM


def _cdiv(a, b):
    return -(-a // b)


def _round_up(a, b):
    return _cdiv(a, b) * b


def _sublane_for(itemsize):
    # Sublane multiple for packed dtypes: 8 for 4B, 16 for 2B, 32 for 1B.
    return max(8, 32 // max(int(itemsize), 1))


def _vmem_row_bytes(cols, itemsize):
    # VMEM footprint of one row after lane padding to 128 (HBM traffic is the
    # true width; VMEM budgeting must use the padded width).
    return _round_up(max(int(cols), 1), _LANE) * int(itemsize)


def _num_tensorcores():
    """Best-effort detection of megacore chips (2 TensorCores per device).

    The split is correct on any chip; on single-TC chips it would just waste a
    little work, so default to 1 unless we positively recognise a megacore.
    """
    try:
        kind = jax.devices()[0].device_kind.lower()
    except Exception:  # pragma: no cover - detection is perf-only
        return 1
    if 'lite' in kind or 'v5e' in kind or 'v6e' in kind or 'v6 lite' in kind:
        return 1
    for tag in ('v4', 'v5p', 'v7'):
        if tag in kind:
            return 2
    return 1


_NUM_CORES = _num_tensorcores()


def _core_split(total_tiles):
    nc = _NUM_CORES if (_NUM_CORES > 1 and total_tiles >= _NUM_CORES) else 1
    return nc, _cdiv(total_tiles, nc)


def _mosaic_params(dimension_semantics, vmem_need_bytes):
    limit = int(min(max(vmem_need_bytes, _VMEM_LIMIT_FLOOR), _VMEM_LIMIT_CEIL))
    return pltpu.CompilerParams(dimension_semantics=dimension_semantics,
                                vmem_limit_bytes=limit)


def _lead_tile(n, row_bytes, budget, sublane=8, max_rows=_MAX_TILE_ROWS):
    """Largest leading-dim tile (multiple of `sublane`) within a VMEM budget."""
    cap = max(int(budget) // max(int(row_bytes), 1), sublane)
    cap = min(cap, max_rows)
    cap = max((cap // sublane) * sublane, sublane)
    return n if n <= cap else cap


# -----------------------------------------------------------------------------
# layout helpers
# -----------------------------------------------------------------------------
def _as_lane_rows(x):
    """Flatten to [rows, 128] keeping the *native* dtype.

    When the element count is lane-divisible this is a pure (free) reshape.
    Only the ragged tail (< 128 elements) is padded with zeros, which is
    numerically neutral for every loss routed through this path (f(0,...)=0).
    TODO(synk): for very large tensors with numel % 128 != 0 this pad is a full
    HBM copy; an in-kernel element mask over the original shape would avoid it.
    """
    flat = jnp.ravel(jnp.asarray(x))
    n = flat.shape[0]
    rows = _cdiv(n, _LANE)
    pad = rows * _LANE - n
    if pad:
        flat = jnp.concatenate([flat, jnp.zeros((pad,), flat.dtype)])
    return flat.reshape(rows, _LANE)


# -----------------------------------------------------------------------------
# generic tiled elementwise reduction (mse / kd_mse / kl / nonvanilla_kl)
# -----------------------------------------------------------------------------
def _tiled_elementwise_sum(make_term, arrays):
    """sum(make_term(*arrays)) over [rows,128] slabs.

    Grid = (cores, tiles-per-core).  The 'parallel' core axis lets a megacore
    chip stream half the rows per TensorCore (each emits a partial sum); the
    tile axis is an 'arbitrary' reduction into an (8,128) f32 accumulator with
    one cross-lane reduce per core at the very end.
    """
    rows = arrays[0].shape[0]
    nin = len(arrays)
    itemsizes = [a.dtype.itemsize for a in arrays]
    per_input_budget = min(max(_EW_TOTAL_BUDGET // nin, 1 << 20), 4 << 20)
    sublane = _sublane_for(min(itemsizes))
    tile_rows = _lead_tile(rows, _LANE * max(itemsizes), per_input_budget,
                           sublane=sublane)
    total_tiles = _cdiv(rows, tile_rows)
    ncores, tpc = _core_split(total_tiles)
    clamp = (ncores * tpc) != total_tiles
    need_mask = (ncores * tpc * tile_rows) != rows
    grouped = (tile_rows % 8 == 0)
    acc_shape = (8, _LANE) if grouped else (tile_rows, _LANE)

    def tmap(c, i):
        t = c * tpc + i
        return jnp.minimum(t, total_tiles - 1) if clamp else t

    def kernel(*refs):
        in_refs, o_ref, acc_ref = refs[:nin], refs[nin], refs[nin + 1]

        @pl.when(pl.program_id(1) == 0)
        def _():
            acc_ref[...] = jnp.zeros_like(acc_ref)

        term = make_term(*[ref[...].astype(jnp.float32) for ref in in_refs])
        if need_mask:
            # Use the *unclamped* tile index so duplicated (clamped) tiles on
            # the overhang steps contribute exactly zero.
            tile = pl.program_id(0) * tpc + pl.program_id(1)
            ridx = tile * tile_rows + jax.lax.broadcasted_iota(
                jnp.int32, term.shape, 0)
            term = jnp.where(ridx < rows, term, 0.0)
        if grouped:
            # Fold the (tile_rows,128) term into an (8,128) accumulator one
            # vreg tile at a time: pure VALU adds, minimal acc ld/st traffic.
            acc_ref[...] += term.reshape(-1, 8, _LANE).sum(axis=0)
        else:
            acc_ref[...] += term

        @pl.when(pl.program_id(1) == tpc - 1)
        def _():
            o_ref[...] = jnp.full((1, 1), jnp.sum(acc_ref[...]), jnp.float32)

    block_bytes = sum(tile_rows * _LANE * it for it in itemsizes)
    vmem_need = 2 * block_bytes + int(np.prod(acc_shape)) * 4 + _VMEM_MARGIN

    partials = pl.pallas_call(
        kernel,
        out_shape=jax.ShapeDtypeStruct((ncores, 1), jnp.float32),
        grid_spec=pltpu.PrefetchScalarGridSpec(
            num_scalar_prefetch=0,
            grid=(ncores, tpc),
            in_specs=[pl.BlockSpec((tile_rows, _LANE),
                                   lambda c, i: (tmap(c, i), 0))
                      for _ in arrays],
            out_specs=pl.BlockSpec((1, 1), lambda c, i: (c, 0)),
            scratch_shapes=[pltpu.VMEM(acc_shape, jnp.float32)],
        ),
        compiler_params=_mosaic_params(("parallel", "arbitrary"), vmem_need),
    )(*arrays)
    return jnp.sum(partials)


def _sq_err_term(p, t):
    d = t - p
    return d * d


def _sq_err_masked_term(p, t, m):
    d = t - p
    return d * d * m


def _kl_term(mu, lv):
    return -0.5 * (lv - jnp.exp(lv) - mu * mu + 1.0)


def _nvkl_term(mu1, lv1, mu2, lv2):
    # Exact reformulation of 0.5*lv2-0.5*lv1+(exp(lv1)+(mu1-mu2)^2)/(2*exp(lv2))-0.5
    # using EUP exp() instead of a VALU divide.
    d = mu1 - mu2
    return (0.5 * (lv2 - lv1) + 0.5 * jnp.exp(lv1 - lv2)
            + 0.5 * d * d * jnp.exp(-lv2) - 0.5)


# -----------------------------------------------------------------------------
# cross-entropy family (row-tiled, per-core resident scalar accumulator)
# -----------------------------------------------------------------------------
def _ce_sum(logits, labels2d, rmask2d=None):
    n, c = logits.shape
    tile_n = _lead_tile(n, _vmem_row_bytes(c, logits.dtype.itemsize),
                        _ROW_BUDGET, sublane=_sublane_for(logits.dtype.itemsize))
    total_tiles = _cdiv(n, tile_n)
    ncores, tpc = _core_split(total_tiles)
    clamp = (ncores * tpc) != total_tiles
    need_mask = (ncores * tpc * tile_n) != n
    with_rmask = rmask2d is not None
    # TODO(synk): for very large vocabularies (C ~ 1e5) add a class grid axis
    # with an online (flash-style) logsumexp instead of loading (tile_n, C).

    def tmap(ci, i):
        t = ci * tpc + i
        return jnp.minimum(t, total_tiles - 1) if clamp else t

    def kernel(*refs):
        if with_rmask:
            logits_ref, labels_ref, rmask_ref, o_ref, acc_ref = refs
        else:
            logits_ref, labels_ref, o_ref, acc_ref = refs
            rmask_ref = None

        @pl.when(pl.program_id(1) == 0)
        def _():
            acc_ref[...] = jnp.zeros_like(acc_ref)

        x = logits_ref[...].astype(jnp.float32)                 # [tile_n, C]
        labels = labels_ref[...]                                # [tile_n, 1] int32
        mx = jnp.max(x, axis=-1, keepdims=True)
        lse = mx + jnp.log(jnp.sum(jnp.exp(x - mx), axis=-1, keepdims=True))
        col = jax.lax.broadcasted_iota(jnp.int32, x.shape, 1)
        picked = jnp.sum(jnp.where(col == labels, x, 0.0),
                         axis=-1, keepdims=True)
        per_row = lse - picked                                  # [tile_n, 1]
        if with_rmask:
            per_row = per_row * rmask_ref[...].astype(jnp.float32)
        if need_mask:
            # NOTE: keep this mask *after* the reductions; garbage edge rows
            # may be NaN/Inf and are discarded by the select here.
            t = pl.program_id(0) * tpc + pl.program_id(1)
            ridx = t * tile_n + jax.lax.broadcasted_iota(
                jnp.int32, per_row.shape, 0)
            per_row = jnp.where(ridx < n, per_row, 0.0)
        acc_ref[...] += jnp.sum(per_row)

        @pl.when(pl.program_id(1) == tpc - 1)
        def _():
            o_ref[...] = acc_ref[...]

    arrays = [logits, labels2d] + ([rmask2d] if with_rmask else [])
    in_specs = [pl.BlockSpec((tile_n, c), lambda ci, i: (tmap(ci, i), 0)),
                pl.BlockSpec((tile_n, 1), lambda ci, i: (tmap(ci, i), 0))]
    if with_rmask:
        in_specs.append(pl.BlockSpec((tile_n, 1), lambda ci, i: (tmap(ci, i), 0)))

    vmem_need = 2 * tile_n * (_vmem_row_bytes(c, logits.dtype.itemsize)
                              + _vmem_row_bytes(1, 4) * (2 if with_rmask else 1)
                              ) + _VMEM_MARGIN
    partials = pl.pallas_call(
        kernel,
        out_shape=jax.ShapeDtypeStruct((ncores, 1), jnp.float32),
        grid_spec=pltpu.PrefetchScalarGridSpec(
            num_scalar_prefetch=0, grid=(ncores, tpc),
            in_specs=in_specs,
            out_specs=pl.BlockSpec((1, 1), lambda ci, i: (ci, 0)),
            scratch_shapes=[pltpu.VMEM((1, 1), jnp.float32)],
        ),
        compiler_params=_mosaic_params(("parallel", "arbitrary"), vmem_need),
    )(*arrays)
    return jnp.sum(partials)


def _soft_ce_sum(pred, true, weights):
    b, c = pred.shape
    w = jnp.asarray(weights)
    # Match torch broadcasting semantics of (weights * true * log_probs).
    if w.ndim == 0:
        w2 = jnp.reshape(w, (1, 1)); w_kind = 'const'
    elif w.ndim == 1 and w.shape[0] == c:
        w2 = jnp.reshape(w, (1, c)); w_kind = 'class'
    elif w.ndim == 2 and w.shape == (1, c):
        w2 = w; w_kind = 'class'
    elif w.ndim == 2 and w.shape == (b, 1):
        w2 = w; w_kind = 'row'
    else:
        w2 = jnp.broadcast_to(w, (b, c)); w_kind = 'full'

    tile_b = _lead_tile(b, _vmem_row_bytes(c, pred.dtype.itemsize),
                        _ROW_BUDGET, sublane=_sublane_for(pred.dtype.itemsize))
    total_tiles = _cdiv(b, tile_b)
    ncores, tpc = _core_split(total_tiles)
    clamp = (ncores * tpc) != total_tiles
    need_mask = (ncores * tpc * tile_b) != b

    def tmap(ci, i):
        t = ci * tpc + i
        return jnp.minimum(t, total_tiles - 1) if clamp else t

    def kernel(pred_ref, true_ref, w_ref, o_ref, acc_ref):
        @pl.when(pl.program_id(1) == 0)
        def _():
            acc_ref[...] = jnp.zeros_like(acc_ref)

        x = pred_ref[...].astype(jnp.float32)
        mx = jnp.max(x, axis=-1, keepdims=True)
        lse = mx + jnp.log(jnp.sum(jnp.exp(x - mx), axis=-1, keepdims=True))
        logp = x - lse
        contrib = (w_ref[...].astype(jnp.float32)
                   * true_ref[...].astype(jnp.float32) * logp)
        if need_mask:
            t = pl.program_id(0) * tpc + pl.program_id(1)
            ridx = t * tile_b + jax.lax.broadcasted_iota(
                jnp.int32, contrib.shape, 0)
            contrib = jnp.where(ridx < b, contrib, 0.0)
        acc_ref[...] += -jnp.sum(contrib)

        @pl.when(pl.program_id(1) == tpc - 1)
        def _():
            o_ref[...] = acc_ref[...]

    if w_kind == 'const':
        w_spec = pl.BlockSpec((1, 1), lambda ci, i: (0, 0))
    elif w_kind == 'class':
        w_spec = pl.BlockSpec((1, c), lambda ci, i: (0, 0))
    elif w_kind == 'row':
        w_spec = pl.BlockSpec((tile_b, 1), lambda ci, i: (tmap(ci, i), 0))
    else:
        w_spec = pl.BlockSpec((tile_b, c), lambda ci, i: (tmap(ci, i), 0))

    vmem_need = (2 * tile_b * (_vmem_row_bytes(c, pred.dtype.itemsize)
                               + _vmem_row_bytes(c, true.dtype.itemsize)
                               + _vmem_row_bytes(w2.shape[-1], w2.dtype.itemsize))
                 + _VMEM_MARGIN)
    partials = pl.pallas_call(
        kernel,
        out_shape=jax.ShapeDtypeStruct((ncores, 1), jnp.float32),
        grid_spec=pltpu.PrefetchScalarGridSpec(
            num_scalar_prefetch=0, grid=(ncores, tpc),
            in_specs=[pl.BlockSpec((tile_b, c), lambda ci, i: (tmap(ci, i), 0)),
                      pl.BlockSpec((tile_b, c), lambda ci, i: (tmap(ci, i), 0)),
                      w_spec],
            out_specs=pl.BlockSpec((1, 1), lambda ci, i: (ci, 0)),
            scratch_shapes=[pltpu.VMEM((1, 1), jnp.float32)],
        ),
        compiler_params=_mosaic_params(("parallel", "arbitrary"), vmem_need),
    )(pred, true, w2)
    return jnp.sum(partials)


# -----------------------------------------------------------------------------
# cosine distance (reduce over the marker axis from a lane-dense [R, M*D] slab)
# -----------------------------------------------------------------------------
def _cosine_sum(pred2, true2, n_rows, m, d):
    k = m * d
    itemsize = max(pred2.dtype.itemsize, true2.dtype.itemsize)
    tile_r = _lead_tile(n_rows, _vmem_row_bytes(k, itemsize), _ROW_BUDGET,
                        sublane=_sublane_for(min(pred2.dtype.itemsize,
                                                 true2.dtype.itemsize)))
    total_tiles = _cdiv(n_rows, tile_r)
    ncores, tpc = _core_split(total_tiles)
    clamp = (ncores * tpc) != total_tiles
    need_mask = (ncores * tpc * tile_r) != n_rows

    def tmap(ci, i):
        t = ci * tpc + i
        return jnp.minimum(t, total_tiles - 1) if clamp else t

    def kernel(p_ref, t_ref, o_ref, acc_ref):
        @pl.when(pl.program_id(1) == 0)
        def _():
            acc_ref[...] = jnp.zeros_like(acc_ref)

        a = p_ref[...].astype(jnp.float32)       # [tile_r, m*d]
        bb = t_ref[...].astype(jnp.float32)
        # Constant 0/1 segment-sum matrix: seg[j, o] = 1 iff j % d == o, i.e.
        # it reduces over the marker axis (stride d in the flattened layout)
        # while keeping the d "coordinate" columns.  Tiny MXU matmuls replace
        # the previous per-marker lane slicing (full-width VALU products + an
        # otherwise-idle MXU).
        seg = (jax.lax.broadcasted_iota(jnp.int32, (k, d), 0) % d
               == jax.lax.broadcasted_iota(jnp.int32, (k, d), 1)
               ).astype(jnp.float32)
        dot = jnp.dot(a * bb, seg, preferred_element_type=jnp.float32)
        na2 = jnp.dot(a * a, seg, preferred_element_type=jnp.float32)
        nb2 = jnp.dot(bb * bb, seg, preferred_element_type=jnp.float32)
        eps2 = jnp.float32(1e-16)   # (1e-8)^2; matches torch's max(||.||, eps)
        cos = dot * jax.lax.rsqrt(jnp.maximum(na2, eps2)
                                  * jnp.maximum(nb2, eps2))
        term = 1.0 - cos                          # [tile_r, d]
        if need_mask:
            t = pl.program_id(0) * tpc + pl.program_id(1)
            ridx = t * tile_r + jax.lax.broadcasted_iota(
                jnp.int32, term.shape, 0)
            term = jnp.where(ridx < n_rows, term, 0.0)
        acc_ref[...] += jnp.sum(term)

        @pl.when(pl.program_id(1) == tpc - 1)
        def _():
            o_ref[...] = acc_ref[...]

    # TODO(synk): d (=3) of 128 lanes are live in the VALU/EUP work here; fold
    # rows into lanes if this loss ever dominates end-to-end time.
    vmem_need = (2 * tile_r * (_vmem_row_bytes(k, pred2.dtype.itemsize)
                               + _vmem_row_bytes(k, true2.dtype.itemsize))
                 + _VMEM_MARGIN)
    partials = pl.pallas_call(
        kernel,
        out_shape=jax.ShapeDtypeStruct((ncores, 1), jnp.float32),
        grid_spec=pltpu.PrefetchScalarGridSpec(
            num_scalar_prefetch=0, grid=(ncores, tpc),
            in_specs=[pl.BlockSpec((tile_r, k), lambda ci, i: (tmap(ci, i), 0)),
                      pl.BlockSpec((tile_r, k), lambda ci, i: (tmap(ci, i), 0))],
            out_specs=pl.BlockSpec((1, 1), lambda ci, i: (ci, 0)),
            scratch_shapes=[pltpu.VMEM((1, 1), jnp.float32)],
        ),
        compiler_params=_mosaic_params(("parallel", "arbitrary"), vmem_need),
    )(pred2, true2)
    return jnp.sum(partials)


# -----------------------------------------------------------------------------
# indexed_mse: in-kernel timestep gather (scalar prefetch) + per-sample mean
# -----------------------------------------------------------------------------
def _indexed_l2(pred4, true4, ts):
    """pred4: [B, S, M, D], true4: [B, T, M, D], ts: [B] -> per-sample means [B]."""
    b, s, m, d = pred4.shape

    def kernel(ts_ref, p_ref, t_ref, o_ref):
        del ts_ref  # consumed by the BlockSpec index_maps
        p = p_ref[0].astype(jnp.float32)            # (S, M, D)
        g = t_ref[0, 0].astype(jnp.float32)         # (M, D) -- gathered timestep
        dd = p - g[None]
        nrm = jnp.sqrt(jnp.sum(dd * dd, axis=(-1, -2)))   # (S,)
        o_ref[...] = jnp.full((1, 1), jnp.sum(nrm) / s, jnp.float32)

    out = pl.pallas_call(
        kernel,
        out_shape=jax.ShapeDtypeStruct((b, 1), jnp.float32),
        grid_spec=pltpu.PrefetchScalarGridSpec(
            num_scalar_prefetch=1, grid=(b,),
            in_specs=[pl.BlockSpec((1, s, m, d), lambda i, ts: (i, 0, 0, 0)),
                      pl.BlockSpec((1, 1, m, d), lambda i, ts: (i, ts[i], 0, 0))],
            out_specs=pl.BlockSpec((1, 1), lambda i, ts: (i, 0)),
        ),
        compiler_params=pltpu.CompilerParams(
            dimension_semantics=("arbitrary",)),
    )(ts, pred4, true4)
    return out[:, 0]


# -----------------------------------------------------------------------------
# the module (dispatcher + loss methods), mirroring the PyTorch semantics
# -----------------------------------------------------------------------------
class ComputeLossPallas:

    def __init__(self, **args):
        for key, value in args.items():
            setattr(self, key, value)

    # ---- dispatcher (forward) ----
    def forward(self, inp_data, out_data, loss_name, loss_function):
        if loss_function in ('nonvanilla_kl_loss', 'kd_mse'):
            loss = getattr(self, loss_function)(
                out_data['_'.join([loss_name, 'prior'])],
                out_data['_'.join([loss_name, 'posterior'])])
        elif loss_function == 'kl_loss':
            loss = self.kl_loss(out_data[loss_name])
        elif loss_function in ('l1', 'mse', 'binary_cross_entropy',
                               'cosine_distance'):
            cm = (1 if loss_name + '_confidence' not in inp_data
                  else inp_data[loss_name + '_confidence'])
            loss = getattr(self, loss_function)(
                out_data[loss_name], inp_data[loss_name], cm)
        elif loss_function == 'soft_cross_entropy':
            loss = self.soft_cross_entropy(
                out_data[loss_name], inp_data[loss_name],
                inp_data[loss_name + '_class_weights'])
        elif loss_function == 'cross_entropy':
            loss = self.cross_entropy(out_data[loss_name], inp_data[loss_name])
        elif loss_function == 'padded_cross_entropy':
            mask = inp_data.get(loss_name + '_mask', None)
            loss = self.padded_cross_entropy(
                out_data[loss_name], inp_data[loss_name],
                inp_data[loss_name + '_unpadded_length'], mask)
        elif loss_function == 'indexed_mse':
            loss = self.indexed_mse(out_data, inp_data, loss_name)
        else:
            raise ValueError(f'Unknown loss function: {loss_function}')
        loss = jnp.asarray(loss)
        if loss.ndim != 0:
            return jnp.sum(loss) / loss.shape[0]
        return loss

    # ---- loss functions ----
    def mse(self, pred_data, true_data, confidence_mask):
        pred = jnp.asarray(pred_data)
        true = jnp.asarray(true_data)
        batch = true.shape[0]
        cm = confidence_mask
        if isinstance(cm, (int, float)):
            total = _tiled_elementwise_sum(
                _sq_err_term, [_as_lane_rows(pred), _as_lane_rows(true)])
            total = total * float(cm)
        else:
            cm = jnp.asarray(cm)
            if cm.ndim == 0:
                total = _tiled_elementwise_sum(
                    _sq_err_term, [_as_lane_rows(pred), _as_lane_rows(true)])
                total = total * cm.astype(jnp.float32)
            else:
                if cm.shape != true.shape:
                    # TODO(synk): a lower-rank broadcastable mask is materialized
                    # full-size here; a block-reusing BlockSpec would avoid the
                    # extra HBM stream.
                    cm = jnp.broadcast_to(cm, true.shape)
                total = _tiled_elementwise_sum(
                    _sq_err_masked_term,
                    [_as_lane_rows(pred), _as_lane_rows(true),
                     _as_lane_rows(cm)])
        return total / batch

    def time_mse(self, pred_data, true_data):
        assert len(pred_data.shape) > 2
        total = _tiled_elementwise_sum(
            _sq_err_term,
            [_as_lane_rows(pred_data), _as_lane_rows(true_data)])
        return total / (true_data.shape[0] * true_data.shape[1])

    def kd_mse(self, data):
        # NOTE: faithful to the original method signature (takes a dict with
        # 'true' / 'pred'); the original forward() call site for 'kd_mse'
        # passes two args and would TypeError there too.
        true_data, pred_data = data['true'], data['pred']
        batch = jnp.asarray(true_data).shape[0]
        total = _tiled_elementwise_sum(
            _sq_err_term,
            [_as_lane_rows(pred_data), _as_lane_rows(true_data)])
        return total / batch

    def kl_loss(self, out_data):
        mu, lv = out_data['mu'], out_data['log_var']
        batch = jnp.asarray(mu).shape[0]
        total = _tiled_elementwise_sum(
            _kl_term, [_as_lane_rows(mu), _as_lane_rows(lv)])
        return total / batch

    def nonvanilla_kl_loss(self, prior, posterior):
        mu1, lv1 = prior['mu'], prior['log_var']
        mu2, lv2 = posterior['mu'], posterior['log_var']
        batch = jnp.asarray(mu1).shape[0]
        total = _tiled_elementwise_sum(
            _nvkl_term,
            [_as_lane_rows(mu1), _as_lane_rows(lv1),
             _as_lane_rows(mu2), _as_lane_rows(lv2)])
        return total / batch

    def cross_entropy(self, out_data, inp_data):
        batch = out_data.shape[0]
        c = out_data.shape[-1]
        logits = jnp.reshape(jnp.asarray(out_data), (-1, c))
        labels = jnp.reshape(jnp.asarray(inp_data), (-1,)).astype(jnp.int32)[:, None]
        return _ce_sum(logits, labels) / batch

    def padded_cross_entropy(self, out_data, inp_data, padded_length, mask):
        b, t, c = out_data.shape
        logits = jnp.reshape(jnp.asarray(out_data), (-1, c))
        labels = jnp.reshape(jnp.asarray(inp_data), (-1,)).astype(jnp.int32)[:, None]
        valid = (jnp.arange(t)[None, :]
                 < jnp.asarray(padded_length)[:, None]).astype(jnp.float32)
        if mask is not None:
            valid = valid * jnp.asarray(mask, jnp.float32)
        rmask = valid.reshape(-1, 1)
        # per-batch weights are all ones, so mean(per-batch sums) == total / B
        return _ce_sum(logits, labels, rmask) / b

    def soft_cross_entropy(self, pred_data, true_data, weights):
        pred = jnp.asarray(pred_data)
        batch = pred.shape[0]
        return _soft_ce_sum(pred, jnp.asarray(true_data), weights) / batch

    def cosine_distance(self, pred_data, true_data, confidence_mask=None):
        # NOTE: the original torch method takes 2 args but forward() passes 3;
        # the extra arg is accepted & ignored for dispatcher compatibility.
        # torch permutes [0,1,2,4,3] then reduces dim=-1, i.e. the cosine runs
        # over the original axis -2; we reduce over that axis directly from a
        # lane-dense [R, M*D] slab (no HBM transpose pass).
        p = jnp.asarray(pred_data)
        t = jnp.asarray(true_data)
        m, d = t.shape[-2], t.shape[-1]
        r = int(np.prod(t.shape[:-2]))
        total = _cosine_sum(p.reshape(r, m * d), t.reshape(r, m * d), r, m, d)
        return total / t.shape[0]

    def indexed_mse(self, out_data, inp_data, loss_name):
        pred = jnp.asarray(out_data[loss_name])          # [B, (...,) M, D]
        true = jnp.asarray(inp_data[loss_name])          # [B, T, M, D]
        ts = jnp.asarray(out_data[loss_name + '_timestep']).astype(jnp.int32)
        b = pred.shape[0]
        m, d = true.shape[-2], true.shape[-1]
        s = int(np.prod(pred.shape[1:-2])) if pred.ndim > 3 else 1
        pred4 = pred.reshape(b, max(s, 1), m, d)
        # Gather + per-sample mean happen inside the kernel (scalar prefetch on
        # ts); the torch loop semantics (mean over extra dims per sample) hold.
        return _indexed_l2(pred4, true, ts)              # [B]

    __call__ = forward


# -----------------------------------------------------------------------------
# test
# -----------------------------------------------------------------------------
def _check(name, got, want, atol=2e-4, rtol=2e-4):
    np.testing.assert_allclose(np.asarray(got), np.asarray(want),
                               atol=atol, rtol=rtol, err_msg=name)


if __name__ == "__main__":
    key = jax.random.PRNGKey(0)
    ks = jax.random.split(key, 20)

    B, T, C, H, F = 2, 8, 10, 64, 8
    module = ComputeLossPallas()
    results = []

    # ---- mse (with confidence mask) ----
    pred = jax.random.normal(ks[0], (B, T, F), jnp.float32)
    true = jax.random.normal(ks[1], (B, T, F), jnp.float32)
    conf = (jax.random.uniform(ks[2], (B, T, F)) > 0.3).astype(jnp.float32)
    loss = module.forward({'pose': true, 'pose_confidence': conf},
                          {'pose': pred}, 'pose', 'mse')
    ref = jnp.sum((true - pred) ** 2 * conf) / B
    _check('mse', loss, ref)
    results.append(loss)

    # ---- kl_loss ----
    mu = jax.random.normal(ks[3], (B, H), jnp.float32)
    lv = 0.1 * jax.random.normal(ks[4], (B, H), jnp.float32)
    loss = module.forward({}, {'latent': {'mu': mu, 'log_var': lv}},
                          'latent', 'kl_loss')
    ref = jnp.sum(-0.5 * (lv - jnp.exp(lv) - mu ** 2 + 1.0)) / B
    _check('kl_loss', loss, ref)
    results.append(loss)

    # ---- nonvanilla_kl_loss ----
    mu1 = jax.random.normal(ks[5], (B, H), jnp.float32)
    lv1 = 0.1 * jax.random.normal(ks[6], (B, H), jnp.float32)
    mu2 = jax.random.normal(ks[7], (B, H), jnp.float32)
    lv2 = 0.1 * jax.random.normal(ks[8], (B, H), jnp.float32)
    loss = module.forward(
        {}, {'z_prior': {'mu': mu1, 'log_var': lv1},
             'z_posterior': {'mu': mu2, 'log_var': lv2}},
        'z', 'nonvanilla_kl_loss')
    ref = jnp.sum(0.5 * lv2 - 0.5 * lv1
                  + (jnp.exp(lv1) + (mu1 - mu2) ** 2) / (2 * jnp.exp(lv2))
                  - 0.5) / B
    _check('nonvanilla_kl_loss', loss, ref)
    results.append(loss)

    # ---- cross_entropy ----
    logits = jax.random.normal(ks[9], (B, T, C), jnp.float32)
    labels = jax.random.randint(ks[10], (B, T), 0, C)
    loss = module.forward({'action': labels}, {'action': logits},
                          'action', 'cross_entropy')
    lp = jax.nn.log_softmax(logits.reshape(-1, C), axis=-1)
    ce = -jnp.take_along_axis(lp, labels.reshape(-1)[:, None], axis=-1)[:, 0]
    ref = jnp.sum(ce) / B
    _check('cross_entropy', loss, ref)
    results.append(loss)

    # ---- padded_cross_entropy ----
    lengths = jnp.array([5, 7], jnp.int32)
    pmask = (jax.random.uniform(ks[11], (B, T)) > 0.2).astype(jnp.float32)
    loss = module.forward(
        {'seq': labels, 'seq_unpadded_length': lengths, 'seq_mask': pmask},
        {'seq': logits}, 'seq', 'padded_cross_entropy')
    valid = (jnp.arange(T)[None, :] < lengths[:, None]).astype(jnp.float32) * pmask
    ref = jnp.mean(jnp.sum(ce.reshape(B, T) * valid, axis=1))
    _check('padded_cross_entropy', loss, ref)
    results.append(loss)

    # ---- soft_cross_entropy ----
    sc_logits = jax.random.normal(ks[12], (B, C), jnp.float32)
    soft_true = jax.nn.softmax(jax.random.normal(ks[13], (B, C)), axis=-1)
    cls_w = jax.random.uniform(ks[14], (1, C), jnp.float32) + 0.5
    loss = module.forward({'cls': soft_true, 'cls_class_weights': cls_w},
                          {'cls': sc_logits}, 'cls', 'soft_cross_entropy')
    ref = -(jnp.broadcast_to(cls_w, sc_logits.shape) * soft_true
            * jax.nn.log_softmax(sc_logits, axis=1)).sum() / B
    _check('soft_cross_entropy', loss, ref)
    results.append(loss)

    # ---- cosine_distance ----
    cp = jax.random.normal(ks[15], (B, 2, 2, 4, 3), jnp.float32)
    ct = jax.random.normal(ks[16], (B, 2, 2, 4, 3), jnp.float32)
    loss = module.forward({'feat': ct}, {'feat': cp}, 'feat', 'cosine_distance')
    perm = (0, 1, 2, 4, 3)
    a, b = jnp.transpose(cp, perm), jnp.transpose(ct, perm)
    cos = jnp.sum(a * b, -1) / (jnp.maximum(jnp.linalg.norm(a, axis=-1), 1e-8)
                                * jnp.maximum(jnp.linalg.norm(b, axis=-1), 1e-8))
    ref = jnp.sum(1.0 - cos) / B
    # Looser tolerance: the in-kernel segment-sum matmul may run at the MXU's
    # default (reduced) f32 precision.
    _check('cosine_distance', loss, ref, atol=2e-2, rtol=2e-2)
    results.append(loss)

    # ---- indexed_mse ----
    im_pred = jax.random.normal(ks[17], (B, 4, 3), jnp.float32)
    im_true = jax.random.normal(ks[18], (B, T, 4, 3), jnp.float32)
    im_ts = jnp.array([2, 5], jnp.int32)
    loss = module.forward({'mid': im_true},
                          {'mid': im_pred, 'mid_timestep': im_ts},
                          'mid', 'indexed_mse')
    diff = im_pred - im_true[jnp.arange(B), im_ts]
    ref_vec = jnp.sqrt(jnp.sum(diff ** 2, axis=(-1, -2)))
    ref = jnp.sum(ref_vec) / B
    _check('indexed_mse', loss, ref)
    results.append(loss)

    # TODO(synk): 'l1' and 'binary_cross_entropy' are dispatched to in the
    # original forward() but never defined on the module (would AttributeError
    # in PyTorch as well), so they are not implemented here.

    jax.block_until_ready(results)
    print("KERNEL_OK")
</pallas_src>

<mosaic_0001>
module attributes {stable_mosaic.version = 11 : i64} {
  func.func @kernel(%arg0: i32, %arg1: i32, %arg2: memref<1x128xf32, #tpu.memory_space<vmem>>, %arg3: memref<1x128xf32, #tpu.memory_space<vmem>>, %arg4: memref<1x128xf32, #tpu.memory_space<vmem>>, %arg5: memref<1x1xf32, #tpu.memory_space<vmem>>, %arg6: memref<1x128xf32, #tpu.memory_space<vmem>>) attributes {dimension_semantics = [#tpu.dimension_semantics<parallel>, #tpu.dimension_semantics<arbitrary>], iteration_bounds = array<i64: 1, 1>, scalar_prefetch = 0 : i64, scratch_operands = 1 : i64, tpu.core_type = #tpu.core_type<tc>, window_params = [{transform_indices = @transform_0, window_bounds = array<i64: 1, 128>}, {transform_indices = @transform_1, window_bounds = array<i64: 1, 128>}, {transform_indices = @transform_2, window_bounds = array<i64: 1, 128>}, {transform_indices = @transform_3, window_bounds = array<i64: 1, 1>}]} {
    %c0_i32 = arith.constant 0 : i32
    %0 = arith.cmpi eq, %arg1, %c0_i32 : i32
    %1 = arith.extui %0 : i1 to i32
    %c0_i32_0 = arith.constant 0 : i32
    %2 = arith.cmpi ne, %1, %c0_i32_0 : i32
    scf.if %2 {
      %cst = arith.constant 0.000000e+00 : f32
      %15 = vector.broadcast %cst : f32 to vector<1x128xf32>
      %c0_12 = arith.constant 0 : index
      %c0_13 = arith.constant 0 : index
      %16 = vector.load %arg6[%c0_12, %c0_13] : memref<1x128xf32, #tpu.memory_space<vmem>>, vector<1x128xf32>
      tpu.vector_store %arg6[%c0_12, %c0_13], %15 {strides = array<i32>} : memref<1x128xf32, #tpu.memory_space<vmem>>, vector<1x128xf32>,
    } else {
    }
    %c0 = arith.constant 0 : index
    %c0_1 = arith.constant 0 : index
    %3 = vector.load %arg2[%c0, %c0_1] : memref<1x128xf32, #tpu.memory_space<vmem>>, vector<1x128xf32>
    %c0_2 = arith.constant 0 : index
    %c0_3 = arith.constant 0 : index
    %4 = vector.load %arg3[%c0_2, %c0_3] : memref<1x128xf32, #tpu.memory_space<vmem>>, vector<1x128xf32>
    %c0_4 = arith.constant 0 : index
    %c0_5 = arith.constant 0 : index
    %5 = vector.load %arg4[%c0_4, %c0_5] : memref<1x128xf32, #tpu.memory_space<vmem>>, vector<1x128xf32>
    %6 = arith.subf %4, %3 : vector<1x128xf32>
    %7 = arith.mulf %6, %6 : vector<1x128xf32>
    %8 = arith.mulf %7, %5 : vector<1x128xf32>
    %c0_6 = arith.constant 0 : index
    %c0_7 = arith.constant 0 : index
    %9 = vector.load %arg6[%c0_6, %c0_7] : memref<1x128xf32, #tpu.memory_space<vmem>>, vector<1x128xf32>
    %10 = arith.addf %9, %8 : vector<1x128xf32>
    %c0_8 = arith.constant 0 : index
    %c0_9 = arith.constant 0 : index
    %11 = vector.load %arg6[%c0_8, %c0_9] : memref<1x128xf32, #tpu.memory_space<vmem>>, vector<1x128xf32>
    tpu.vector_store %arg6[%c0_8, %c0_9], %10 {strides = array<i32>} : memref<1x128xf32, #tpu.memory_space<vmem>>, vector<1x128xf32>,
    %c0_i32_10 = arith.constant 0 : i32
    %12 = arith.cmpi eq, %arg1, %c0_i32_10 : i32
    %13 = arith.extui %12 : i1 to i32
    %c0_i32_11 = arith.constant 0 : i32
    %14 = arith.cmpi ne, %13, %c0_i32_11 : i32
    scf.if %14 {
      %c0_12 = arith.constant 0 : index
      %c0_13 = arith.constant 0 : index
      %15 = vector.load %arg6[%c0_12, %c0_13] : memref<1x128xf32, #tpu.memory_space<vmem>>, vector<1x128xf32>
      %16 = vector.shape_cast %15 : vector<1x128xf32> to vector<1x1x128xf32>
      %cst = arith.constant dense<0.000000e+00> : vector<1xf32>
      %17 = vector.multi_reduction <add>, %16, %cst [1, 2] : vector<1x1x128xf32> to vector<1xf32>
      %18 = vector.shape_cast %17 : vector<1xf32> to vector<1x1x1xf32>
      %19 = vector.extract %18[0, 0, 0] : f32 from vector<1x1x1xf32>
      %20 = vector.broadcast %19 : f32 to vector<1x1xf32>
      %c0_14 = arith.constant 0 : index
      %c0_15 = arith.constant 0 : index
      %21 = vector.load %arg5[%c0_14, %c0_15] : memref<1x1xf32, #tpu.memory_space<vmem>>, vector<1x1xf32>
      tpu.vector_store %arg5[%c0_14, %c0_15], %20 {strides = array<i32>} : memref<1x1xf32, #tpu.memory_space<vmem>>, vector<1x1xf32>,
    } else {
    }
    return
  }
  func.func @transform_0(%arg0: i32, %arg1: i32) -> (i32, i32) {
    %c1_i32 = arith.constant 1 : i32
    %0 = arith.muli %arg0, %c1_i32 : i32
    %1 = arith.addi %0, %arg1 : i32
    %c0_i32 = arith.constant 0 : i32
    %c0_i32_0 = arith.constant 0 : i32
    return %1, %c0_i32 : i32, i32
  }
  func.func @transform_1(%arg0: i32, %arg1: i32) -> (i32, i32) {
    %c1_i32 = arith.constant 1 : i32
    %0 = arith.muli %arg0, %c1_i32 : i32
    %1 = arith.addi %0, %arg1 : i32
    %c0_i32 = arith.constant 0 : i32
    %c0_i32_0 = arith.constant 0 : i32
    return %1, %c0_i32 : i32, i32
  }
  func.func @transform_2(%arg0: i32, %arg1: i32) -> (i32, i32) {
    %c1_i32 = arith.constant 1 : i32
    %0 = arith.muli %arg0, %c1_i32 : i32
    %1 = arith.addi %0, %arg1 : i32
    %c0_i32 = arith.constant 0 : i32
    %c0_i32_0 = arith.constant 0 : i32
    return %1, %c0_i32 : i32, i32
  }
  func.func @transform_3(%arg0: i32, %arg1: i32) -> (i32, i32) {
    %c0_i32 = arith.constant 0 : i32
    %c0_i32_0 = arith.constant 0 : i32
    return %arg0, %c0_i32 : i32, i32
  }
}

</mosaic_0001>

<bundles_post_ra>
// kernel: tpu_custom_call.1
= control target key start
LH: loop header
LB: loop body
LE: loop exit
PB: predicated region body
PF: predicated region fallthrough
CT: control target
= control target key end

     0   :  { %8 = vsyncpa [#allocation4], 0  ;;  %s236_s0 = inlined_call_operand.hbm [shape: f32[1,128], index: 0, kind: input, shape index: {}]   ;;  %s237_s1 = inlined_call_operand.hbm [shape: f32[1,128], index: 1, kind: input, shape index: {}]   ;;  %s238_s2 = inlined_call_operand.vmem [shape: f32[1,128], index: 2, kind: input, shape index: {}]   ;;  %s239_s3 = inlined_call_operand.hbm [shape: f32[1,1], index: 3, kind: output, shape index: {}]  }
   0x1   :  { %9 = vsyncpa [#allocation7], 0 }
   0x2   :  { %10 = vsyncpa [#allocation5], 0  ;;  %s18_s14 = sshll.u32 %s236_s0, 4  ;;  %s200_s15 = smov [#allocation3]   ;;  %s19_s14 = int_to_ptr.hbm [resolvable:$true] %s18_s14 }
   0x3   :  { %s20_s16 = sshll.u32 %s200_s15, 4  ;;  %s31_s19 = sshll.u32 %s237_s1, 4  ;;  %s21_s16 = int_to_ptr.vmem [resolvable:$true] %s20_s16  ;;  %s32_s19 = int_to_ptr.hbm [resolvable:$true] %s31_s19 }
   0x4   :  { %23 = dma.hbm_to_vmem [thread:$0]  %s19_s14, 16, %s21_s16, [#allocation4]  }
   0x5   :  { %s201_s20 = smov [#allocation6]  }
   0x6   :  { %s33_s21 = sshll.u32 %s201_s20, 4  ;;  %s34_s21 = int_to_ptr.vmem [resolvable:$true] %s33_s21 }
   0x7   :  { %36 = dma.hbm_to_vmem [thread:$0]  %s32_s19, 16, %s34_s21, [#allocation7]  }
   0x8   :  { %194 = dma.done.wait [#allocation4], 16  }
   0x9   :  { %195 = vsyncadd [#allocation4], 4294967280 }
   0xa   :  { %196 = dma.done.wait [#allocation7], 16  }
   0xb   :  { %197 = vsyncadd [#allocation7], 4294967280  ;;  %v202_v0 = vmov 0.0   ;;  %v68_v1 = vld [vmem:[#allocation3] sm:$0x1]  ;;  %vm81_vm0 = vcmask 1040384  }
   0xc   :  { %67 = vst [vmem:[#allocation2] sm:$0x1] %v202_v0  ;;  %v69_v2 = vld [vmem:[#allocation6] sm:$0x1]  ;;  %v70_v4 = vld [vmem:[%s238_s2] sm:$0x1] }
   0xd   :  { %v71_v3 = vsub.f32 %v69_v2, %v68_v1  ;;  %s203_s1 = smov [#allocation8]   ;;  %s102_s25 = sshll.u32 %s239_s3, 4  ;;  %vm93_vm1 = vcmask 0   ;;  %s103_s25 = int_to_ptr.hbm [resolvable:$true] %s102_s25 }
   0xe   :  { %s100_s23 = sshll.u32 %s203_s1, 4  ;;  %s101_s23 = int_to_ptr.vmem [resolvable:$true] %s100_s23 }
   0xf   :  { %v72_v5 = vmul.f32 %v71_v3, %v71_v3 }
  0x11   :  { %v73_v7 = vmul.f32 %v72_v5, %v70_v4 }
  0x13   :  { %v74_v6 = vld [vmem:[#allocation2] sm:$0x1] }
  0x14   :  { %v75_v8 = vadd.f32 %v74_v6, %v73_v7 }
  0x16   :  { %76 = vst [vmem:[#allocation2] sm:$0x1] %v75_v8 }
  0x1d   :  { %v80_v9 = vld [vmem:[#allocation2] sm:$0x1] }
  0x1e   :  { %v82_v10 = vsel %vm81_vm0, %v80_v9, 0.0 }
  0x1f   :  { %83 = vadd.xlane.f32.xlu0 %v82_v10 }
  0x92   :  { %v84_v11 = vpop.xlane.xlu0 %83 }
  0x93   :  { %v85_v12 = vrot.slane %v84_v11, 4 }
  0x95   :  { %v86_v13 = vadd.f32 %v85_v12, %v84_v11 }
  0x97   :  { %v87_v14 = vrot.slane %v86_v13, 2 }
  0x99   :  { %v88_v15 = vadd.f32 %v87_v14, %v86_v13 }
  0x9b   :  { %v89_v16 = vrot.slane %v88_v15, 1 }
  0x9d   :  { %v90_v17 = vadd.f32 %v89_v16, %v88_v15 }
  0x9f   :  { %116 = vpush %v90_v17 }
  0xd0   :  { %s117_s26 = spop %116 }
  0xd1   :  { %v92_v18 = vstv %s117_s26 }
  0xd2   :  { %94 = vst.msk [vmem:[#allocation8] sm:$0x1] %vm93_vm1, %v92_v18 }
  0xd3   :  { %105 = dma.vmem_to_hbm [thread:$0]  %s101_s23, 16, %s103_s25, [#allocation5]  }
  0xd4   :  { %198 = dma.done.wait [#allocation5], 16  }
  0xd5   :  { %199 = vsyncadd [#allocation5], 4294967280 }
  0xd6   :  { %110 = vsyncpa [#allocation4], 1 }
  0xd7   :  { %111 = vsyncpa [#allocation7], 1 }
  0xd8   :  { %112 = vsyncpa [#allocation5], 1 }

</bundles_post_ra>
